<compile_context>
chip_gen: v6e
topology: v6e:2x2x1
jax: 0.10.0
libtpu: 0.0.40
codegen_flags: <defaults>
</compile_context>

<pallas_src>
import functools

import jax
import jax.numpy as jnp
from jax.experimental import pallas as pl
from jax.experimental.pallas import tpu as pltpu

_NEG = -1e30  # finite "minus infinity" (avoids inf - inf NaNs in the online max)


def _cdiv(a, b):
    return -(-a // b)


def _round_up(a, b):
    return _cdiv(a, b) * b


def _vmem_capacity_bytes():
    try:
        info = pltpu.get_tpu_info()
        cap = int(getattr(info, "vmem_capacity_bytes", 0) or 0)
        if cap > 0:
            return cap
    except Exception:
        pass
    return 64 * 1024 * 1024  # conservative fallback: v7x per-TensorCore VMEM


def _pixelwise_kl_kernel(s_ref, t_ref, out_ref,
                         m_s_ref, l_s_ref, m_t_ref, l_t_ref, a_ref,
                         *, inv_tau, rows, cols, need_row_mask, need_col_mask):
    i = pl.program_id(0)          # row-tile index   ("parallel")
    j = pl.program_id(1)          # column-tile index (softmax reduction, "arbitrary")
    n_j = pl.num_programs(1)
    tile_rows, tile_cols = s_ref.shape

    # Reset the per-row online-softmax state at the first column tile of each row tile.
    @pl.when(j == 0)
    def _():
        m_s_ref[...] = jnp.full_like(m_s_ref, _NEG)
        m_t_ref[...] = jnp.full_like(m_t_ref, _NEG)
        l_s_ref[...] = jnp.zeros_like(l_s_ref)
        l_t_ref[...] = jnp.zeros_like(l_t_ref)
        a_ref[...] = jnp.zeros_like(a_ref)

    s = s_ref[...].astype(jnp.float32)
    t = t_ref[...].astype(jnp.float32)
    if inv_tau is not None:       # trace-time branch: zero extra ops when tau == 1
        s = s * inv_tau
        t = t * inv_tau

    if need_col_mask:             # only emitted when the column axis is ragged
        col_ids = jax.lax.broadcasted_iota(jnp.int32, (tile_rows, tile_cols), 1)
        col_ok = (j * tile_cols + col_ids) < cols
        s_eff = jnp.where(col_ok, s, _NEG)
        t_eff = jnp.where(col_ok, t, _NEG)
        s_for_a = jnp.where(col_ok, s, 0.0)   # zero-masked so e_t * garbage can't NaN
    else:
        s_eff = s
        t_eff = t
        s_for_a = s

    # Online softmax statistics per row (all kept in float32):
    #   m_* running max, l_* running sum exp(x - m),
    #   a   running sum exp(t - m_t) * s   (teacher-weighted student logits).
    m_s_prev = m_s_ref[...]
    m_t_prev = m_t_ref[...]
    m_s_new = jnp.maximum(m_s_prev, jnp.max(s_eff, axis=-1, keepdims=True))
    m_t_new = jnp.maximum(m_t_prev, jnp.max(t_eff, axis=-1, keepdims=True))

    alpha_s = jnp.exp(m_s_prev - m_s_new)
    alpha_t = jnp.exp(m_t_prev - m_t_new)

    e_s = jnp.exp(s_eff - m_s_new)
    e_t = jnp.exp(t_eff - m_t_new)

    l_s_ref[...] = alpha_s * l_s_ref[...] + jnp.sum(e_s, axis=-1, keepdims=True)
    l_t_ref[...] = alpha_t * l_t_ref[...] + jnp.sum(e_t, axis=-1, keepdims=True)
    a_ref[...] = alpha_t * a_ref[...] + jnp.sum(e_t * s_for_a, axis=-1, keepdims=True)
    m_s_ref[...] = m_s_new
    m_t_ref[...] = m_t_new

    # Finalize this row tile on the last column tile:
    #   loss_row = logsumexp(s) - sum(softmax(t) * s)
    @pl.when(j == n_j - 1)
    def _():
        lse_s = m_s_ref[...] + jnp.log(l_s_ref[...])
        row_loss = lse_s - a_ref[...] / l_t_ref[...]
        if need_row_mask:         # only emitted when the row axis is ragged
            row_ids = jax.lax.broadcasted_iota(jnp.int32, (tile_rows, 1), 0)
            row_ok = (i * tile_rows + row_ids) < rows
            row_loss = jnp.where(row_ok, row_loss, 0.0)   # garbage rows -> exactly 0
        tile_loss = jnp.sum(row_loss)
        # Lane-dense full-block store; wrapper reads element [i, 0, 0].
        out_ref[...] = jnp.full(out_ref.shape, tile_loss, dtype=out_ref.dtype)


def criterion_pixel_wise_loss_logits(preds_S, preds_T, tau=1.0, loss_weight=1.0,
                                     max_tile_cols=None):
    """JAX/Pallas equivalent of CriterionPixelWiseLossLogits.forward.

    preds_S, preds_T: NCHW arrays of identical shape. Returns a scalar float32 loss.
    max_tile_cols is a testing knob to force column tiling; leave None in production.
    """
    assert preds_S.shape == preds_T.shape, "the output dim of teacher and student differ"
    N, C, W, H = preds_S.shape
    rows = N * C
    cols = W * H

    s2d = preds_S.reshape(rows, cols)   # free: contiguous reshape, no copy
    t2d = preds_T.reshape(rows, cols)

    itemsize = jnp.dtype(preds_S.dtype).itemsize
    # Sublane packing granularity for the row axis: 8 (f32) / 16 (bf16, f16) / 32 (int8/fp8).
    row_gran = 8 * max(1, 4 // itemsize)

    # Generation-aware per-block element budget: inputs are double-buffered in their own
    # dtype and the kernel body keeps a handful of block-sized f32 temporaries; spend
    # roughly half of VMEM on that, capped (diminishing returns past a few MiB per block).
    vmem_cap = _vmem_capacity_bytes()
    bytes_per_elem = 2 * 2 * itemsize + 6 * 4     # 2 inputs x 2 buffers + ~6 f32 temps
    max_block_elems = (vmem_cap // 2) // bytes_per_elem
    max_block_elems = max(row_gran * 128, min(max_block_elems, 3 * 512 * 1024))

    tile_rows_min = rows if rows <= row_gran else row_gran

    # ---- Column (softmax/reduction) tiling ----
    col_cap = cols if max_tile_cols is None else max(128, min(cols, int(max_tile_cols)))
    if col_cap >= cols and tile_rows_min * cols <= max_block_elems:
        tile_cols = cols                          # whole-row single pass (ragged cols OK)
    else:
        tile_cols = max(128, min(((max_block_elems // tile_rows_min) // 128) * 128,
                                 _round_up(col_cap, 128)))
        # Balance the column tiles (avoids a mostly-empty ragged last tile).
        tile_cols = min(tile_cols, _round_up(_cdiv(cols, _cdiv(cols, tile_cols)), 128))
        if tile_cols >= cols:
            tile_cols = cols
    n_col_tiles = _cdiv(cols, tile_cols)
    need_col_mask = n_col_tiles * tile_cols != cols

    # ---- Row tiling ----
    if rows <= row_gran:
        tile_rows = rows                          # block dim == array dim is allowed
    else:
        budget_rows = max(row_gran, ((max_block_elems // tile_cols) // row_gran) * row_gran)
        # v7x megacore: keep at least 2 row tiles on the "parallel" axis.
        half_rows = _round_up(_cdiv(rows, 2), row_gran)
        tile_rows = min(budget_rows, half_rows)
    n_row_tiles = _cdiv(rows, tile_rows)
    need_row_mask = n_row_tiles * tile_rows != rows
    # TODO(synk): when rows <= row_gran there is only one "parallel" tile; splitting the
    # column axis into two independent halves with a tiny combine stage would engage the
    # second v7x TensorCore for that case.

    kernel = functools.partial(
        _pixelwise_kl_kernel,
        inv_tau=None if float(tau) == 1.0 else float(1.0 / float(tau)),
        rows=rows, cols=cols,
        need_row_mask=need_row_mask, need_col_mask=need_col_mask)

    block_bytes = tile_rows * tile_cols * itemsize
    vmem_need = (2 * 2 * block_bytes                 # double-buffered input blocks
                 + 6 * tile_rows * tile_cols * 4     # in-kernel f32 temporaries (estimate)
                 + 5 * tile_rows * 128 * 4           # online-softmax scratch (lane-padded)
                 + 2 * 8 * 128 * 4)                  # output block
    vmem_limit = int(min(max(vmem_need + (8 << 20), 32 << 20), vmem_cap * 3 // 4))

    cost = pl.CostEstimate(
        flops=10 * rows * cols,
        transcendentals=2 * rows * cols,
        bytes_accessed=2 * rows * cols * itemsize)

    partials = pl.pallas_call(
        kernel,
        out_shape=jax.ShapeDtypeStruct((n_row_tiles, 8, 128), jnp.float32),
        grid_spec=pltpu.PrefetchScalarGridSpec(
            num_scalar_prefetch=0,
            grid=(n_row_tiles, n_col_tiles),
            in_specs=[
                pl.BlockSpec((tile_rows, tile_cols), lambda i, j: (i, j)),
                pl.BlockSpec((tile_rows, tile_cols), lambda i, j: (i, j)),
            ],
            out_specs=pl.BlockSpec((1, 8, 128), lambda i, j: (i, 0, 0)),
            scratch_shapes=[pltpu.VMEM((tile_rows, 1), jnp.float32)] * 5,
        ),
        compiler_params=pltpu.CompilerParams(
            dimension_semantics=("parallel", "arbitrary"),
            vmem_limit_bytes=vmem_limit,
        ),
        cost_estimate=cost,
    )(s2d, t2d)

    total = jnp.sum(partials[:, 0, 0])
    return (loss_weight * total / (C * N)).astype(jnp.float32)


def _reference(preds_S, preds_T, tau=1.0, loss_weight=1.0):
    N, C, W, H = preds_S.shape
    s = preds_S.reshape(-1, W * H).astype(jnp.float32) / tau
    t = preds_T.reshape(-1, W * H).astype(jnp.float32) / tau
    p_t = jax.nn.softmax(t, axis=1)
    log_p_s = jax.nn.log_softmax(s, axis=1)
    loss = jnp.sum(-p_t * log_p_s)
    return loss_weight * loss / (C * N)


if __name__ == "__main__":
    key = jax.random.PRNGKey(0)
    k1, k2, k3, k4, k5, k6 = jax.random.split(key, 6)

    # Main case: N=2, C=4, W=H=16 (rows=8, cols=256 -> whole-row single pass, no masks).
    N, C, W, H = 2, 4, 16, 16
    preds_S = jax.random.normal(k1, (N, C, W, H), dtype=jnp.float32)
    preds_T = jax.random.normal(k2, (N, C, W, H), dtype=jnp.float32)

    out = jax.block_until_ready(criterion_pixel_wise_loss_logits(preds_S, preds_T))
    ref = _reference(preds_S, preds_T, 1.0, 1.0)
    assert jnp.allclose(out, ref, rtol=1e-4, atol=1e-5), (out, ref)

    # Non-unit temperature / loss weight (exercises the inv_tau path).
    out2 = jax.block_until_ready(
        criterion_pixel_wise_loss_logits(preds_S, preds_T, tau=2.0, loss_weight=0.5))
    ref2 = _reference(preds_S, preds_T, 2.0, 0.5)
    assert jnp.allclose(out2, ref2, rtol=1e-4, atol=1e-5), (out2, ref2)

    # Forced column tiling (online-softmax across 2 column tiles, no masks).
    out3 = jax.block_until_ready(
        criterion_pixel_wise_loss_logits(preds_S, preds_T, max_tile_cols=128))
    assert jnp.allclose(out3, ref, rtol=1e-4, atol=1e-5), (out3, ref)

    # Ragged rows without any padding (N*C=10 -> 2 row tiles, masked garbage tail),
    # both single-pass and forced column tiling.
    S5 = jax.random.normal(k3, (2, 5, 32, 32), dtype=jnp.float32)
    T5 = jax.random.normal(k4, (2, 5, 32, 32), dtype=jnp.float32)
    ref5 = _reference(S5, T5, 1.0, 1.0)
    out5 = jax.block_until_ready(criterion_pixel_wise_loss_logits(S5, T5))
    assert jnp.allclose(out5, ref5, rtol=1e-4, atol=1e-5), (out5, ref5)
    out5b = jax.block_until_ready(
        criterion_pixel_wise_loss_logits(S5, T5, max_tile_cols=256))
    assert jnp.allclose(out5b, ref5, rtol=1e-4, atol=1e-5), (out5b, ref5)

    # Ragged cols (W*H=160) with forced tiling (column-mask path), f32 and bf16.
    Sb = jax.random.normal(k5, (1, 3, 16, 10), dtype=jnp.float32)
    Tb = jax.random.normal(k6, (1, 3, 16, 10), dtype=jnp.float32)
    ref4 = _reference(Sb, Tb, 1.0, 1.0)
    out4 = jax.block_until_ready(
        criterion_pixel_wise_loss_logits(Sb, Tb, max_tile_cols=128))
    assert jnp.allclose(out4, ref4, rtol=1e-4, atol=1e-5), (out4, ref4)

    Sb16 = Sb.astype(jnp.bfloat16)
    Tb16 = Tb.astype(jnp.bfloat16)
    refb16 = _reference(Sb16, Tb16, 1.0, 1.0)
    outb16 = jax.block_until_ready(
        criterion_pixel_wise_loss_logits(Sb16, Tb16, max_tile_cols=128))
    assert jnp.allclose(outb16, refb16, rtol=2e-3, atol=1e-3), (outb16, refb16)

    print("KERNEL_OK")
</pallas_src>

<mosaic_0001>
module attributes {stable_mosaic.version = 11 : i64} {
  func.func @_pixelwise_kl_kernel(%arg0: i32, %arg1: i32, %arg2: memref<8x256xf32, #tpu.memory_space<vmem>>, %arg3: memref<8x256xf32, #tpu.memory_space<vmem>>, %arg4: memref<1x8x128xf32, #tpu.memory_space<vmem>>, %arg5: memref<8x1xf32, #tpu.memory_space<vmem>>, %arg6: memref<8x1xf32, #tpu.memory_space<vmem>>, %arg7: memref<8x1xf32, #tpu.memory_space<vmem>>, %arg8: memref<8x1xf32, #tpu.memory_space<vmem>>, %arg9: memref<8x1xf32, #tpu.memory_space<vmem>>) attributes {dimension_semantics = [#tpu.dimension_semantics<parallel>, #tpu.dimension_semantics<arbitrary>], iteration_bounds = array<i64: 1, 1>, scalar_prefetch = 0 : i64, scratch_operands = 5 : i64, tpu.core_type = #tpu.core_type<tc>, window_params = [{transform_indices = @transform_0, window_bounds = array<i64: 8, 256>}, {transform_indices = @transform_1, window_bounds = array<i64: 8, 256>}, {transform_indices = @transform_2, window_bounds = array<i64: 1, 8, 128>}]} {
    %c0_i32 = arith.constant 0 : i32
    %0 = arith.cmpi eq, %arg1, %c0_i32 : i32
    %1 = arith.extui %0 : i1 to i32
    %c0_i32_0 = arith.constant 0 : i32
    %2 = arith.cmpi ne, %1, %c0_i32_0 : i32
    scf.if %2 {
      %cst_30 = arith.constant -1.000000e+30 : f32
      %47 = vector.broadcast %cst_30 : f32 to vector<8x1xf32>
      %c0_31 = arith.constant 0 : index
      %c0_32 = arith.constant 0 : index
      %48 = vector.load %arg5[%c0_31, %c0_32] : memref<8x1xf32, #tpu.memory_space<vmem>>, vector<8x1xf32>
      tpu.vector_store %arg5[%c0_31, %c0_32], %47 {strides = array<i32>} : memref<8x1xf32, #tpu.memory_space<vmem>>, vector<8x1xf32>,
      %cst_33 = arith.constant -1.000000e+30 : f32
      %49 = vector.broadcast %cst_33 : f32 to vector<8x1xf32>
      %c0_34 = arith.constant 0 : index
      %c0_35 = arith.constant 0 : index
      %50 = vector.load %arg7[%c0_34, %c0_35] : memref<8x1xf32, #tpu.memory_space<vmem>>, vector<8x1xf32>
      tpu.vector_store %arg7[%c0_34, %c0_35], %49 {strides = array<i32>} : memref<8x1xf32, #tpu.memory_space<vmem>>, vector<8x1xf32>,
      %cst_36 = arith.constant 0.000000e+00 : f32
      %51 = vector.broadcast %cst_36 : f32 to vector<8x1xf32>
      %c0_37 = arith.constant 0 : index
      %c0_38 = arith.constant 0 : index
      %52 = vector.load %arg6[%c0_37, %c0_38] : memref<8x1xf32, #tpu.memory_space<vmem>>, vector<8x1xf32>
      tpu.vector_store %arg6[%c0_37, %c0_38], %51 {strides = array<i32>} : memref<8x1xf32, #tpu.memory_space<vmem>>, vector<8x1xf32>,
      %cst_39 = arith.constant 0.000000e+00 : f32
      %53 = vector.broadcast %cst_39 : f32 to vector<8x1xf32>
      %c0_40 = arith.constant 0 : index
      %c0_41 = arith.constant 0 : index
      %54 = vector.load %arg8[%c0_40, %c0_41] : memref<8x1xf32, #tpu.memory_space<vmem>>, vector<8x1xf32>
      tpu.vector_store %arg8[%c0_40, %c0_41], %53 {strides = array<i32>} : memref<8x1xf32, #tpu.memory_space<vmem>>, vector<8x1xf32>,
      %cst_42 = arith.constant 0.000000e+00 : f32
      %55 = vector.broadcast %cst_42 : f32 to vector<8x1xf32>
      %c0_43 = arith.constant 0 : index
      %c0_44 = arith.constant 0 : index
      %56 = vector.load %arg9[%c0_43, %c0_44] : memref<8x1xf32, #tpu.memory_space<vmem>>, vector<8x1xf32>
      tpu.vector_store %arg9[%c0_43, %c0_44], %55 {strides = array<i32>} : memref<8x1xf32, #tpu.memory_space<vmem>>, vector<8x1xf32>,
    } else {
    }
    %c0 = arith.constant 0 : index
    %c0_1 = arith.constant 0 : index
    %3 = vector.load %arg2[%c0, %c0_1] : memref<8x256xf32, #tpu.memory_space<vmem>>, vector<8x256xf32>
    %c0_2 = arith.constant 0 : index
    %c0_3 = arith.constant 0 : index
    %4 = vector.load %arg3[%c0_2, %c0_3] : memref<8x256xf32, #tpu.memory_space<vmem>>, vector<8x256xf32>
    %c0_4 = arith.constant 0 : index
    %c0_5 = arith.constant 0 : index
    %5 = vector.load %arg5[%c0_4, %c0_5] : memref<8x1xf32, #tpu.memory_space<vmem>>, vector<8x1xf32>
    %c0_6 = arith.constant 0 : index
    %c0_7 = arith.constant 0 : index
    %6 = vector.load %arg7[%c0_6, %c0_7] : memref<8x1xf32, #tpu.memory_space<vmem>>, vector<8x1xf32>
    %cst = arith.constant dense<0xFF800000> : vector<8xf32>
    %7 = vector.multi_reduction <maximumf>, %3, %cst [1] : vector<8x256xf32> to vector<8xf32>
    %8 = vector.shape_cast %7 : vector<8xf32> to vector<8x1xf32>
    %9 = arith.maximumf %5, %8 : vector<8x1xf32>
    %cst_8 = arith.constant dense<0xFF800000> : vector<8xf32>
    %10 = vector.multi_reduction <maximumf>, %4, %cst_8 [1] : vector<8x256xf32> to vector<8xf32>
    %11 = vector.shape_cast %10 : vector<8xf32> to vector<8x1xf32>
    %12 = arith.maximumf %6, %11 : vector<8x1xf32>
    %13 = arith.subf %5, %9 : vector<8x1xf32>
    %14 = math.exp %13 : vector<8x1xf32>
    %15 = arith.subf %6, %12 : vector<8x1xf32>
    %16 = math.exp %15 : vector<8x1xf32>
    %17 = vector.broadcast %9 : vector<8x1xf32> to vector<8x256xf32>
    %18 = arith.subf %3, %17 : vector<8x256xf32>
    %19 = math.exp %18 : vector<8x256xf32>
    %20 = vector.broadcast %12 : vector<8x1xf32> to vector<8x256xf32>
    %21 = arith.subf %4, %20 : vector<8x256xf32>
    %22 = math.exp %21 : vector<8x256xf32>
    %c0_9 = arith.constant 0 : index
    %c0_10 = arith.constant 0 : index
    %23 = vector.load %arg6[%c0_9, %c0_10] : memref<8x1xf32, #tpu.memory_space<vmem>>, vector<8x1xf32>
    %24 = arith.mulf %14, %23 : vector<8x1xf32>
    %cst_11 = arith.constant dense<0.000000e+00> : vector<8xf32>
    %25 = vector.multi_reduction <add>, %19, %cst_11 [1] : vector<8x256xf32> to vector<8xf32>
    %26 = vector.shape_cast %25 : vector<8xf32> to vector<8x1xf32>
    %27 = arith.addf %24, %26 : vector<8x1xf32>
    %c0_12 = arith.constant 0 : index
    %c0_13 = arith.constant 0 : index
    %28 = vector.load %arg6[%c0_12, %c0_13] : memref<8x1xf32, #tpu.memory_space<vmem>>, vector<8x1xf32>
    tpu.vector_store %arg6[%c0_12, %c0_13], %27 {strides = array<i32>} : memref<8x1xf32, #tpu.memory_space<vmem>>, vector<8x1xf32>,
    %c0_14 = arith.constant 0 : index
    %c0_15 = arith.constant 0 : index
    %29 = vector.load %arg8[%c0_14, %c0_15] : memref<8x1xf32, #tpu.memory_space<vmem>>, vector<8x1xf32>
    %30 = arith.mulf %16, %29 : vector<8x1xf32>
    %cst_16 = arith.constant dense<0.000000e+00> : vector<8xf32>
    %31 = vector.multi_reduction <add>, %22, %cst_16 [1] : vector<8x256xf32> to vector<8xf32>
    %32 = vector.shape_cast %31 : vector<8xf32> to vector<8x1xf32>
    %33 = arith.addf %30, %32 : vector<8x1xf32>
    %c0_17 = arith.constant 0 : index
    %c0_18 = arith.constant 0 : index
    %34 = vector.load %arg8[%c0_17, %c0_18] : memref<8x1xf32, #tpu.memory_space<vmem>>, vector<8x1xf32>
    tpu.vector_store %arg8[%c0_17, %c0_18], %33 {strides = array<i32>} : memref<8x1xf32, #tpu.memory_space<vmem>>, vector<8x1xf32>,
    %c0_19 = arith.constant 0 : index
    %c0_20 = arith.constant 0 : index
    %35 = vector.load %arg9[%c0_19, %c0_20] : memref<8x1xf32, #tpu.memory_space<vmem>>, vector<8x1xf32>
    %36 = arith.mulf %16, %35 : vector<8x1xf32>
    %37 = arith.mulf %22, %3 : vector<8x256xf32>
    %cst_21 = arith.constant dense<0.000000e+00> : vector<8xf32>
    %38 = vector.multi_reduction <add>, %37, %cst_21 [1] : vector<8x256xf32> to vector<8xf32>
    %39 = vector.shape_cast %38 : vector<8xf32> to vector<8x1xf32>
    %40 = arith.addf %36, %39 : vector<8x1xf32>
    %c0_22 = arith.constant 0 : index
    %c0_23 = arith.constant 0 : index
    %41 = vector.load %arg9[%c0_22, %c0_23] : memref<8x1xf32, #tpu.memory_space<vmem>>, vector<8x1xf32>
    tpu.vector_store %arg9[%c0_22, %c0_23], %40 {strides = array<i32>} : memref<8x1xf32, #tpu.memory_space<vmem>>, vector<8x1xf32>,
    %c0_24 = arith.constant 0 : index
    %c0_25 = arith.constant 0 : index
    %42 = vector.load %arg5[%c0_24, %c0_25] : memref<8x1xf32, #tpu.memory_space<vmem>>, vector<8x1xf32>
    tpu.vector_store %arg5[%c0_24, %c0_25], %9 {strides = array<i32>} : memref<8x1xf32, #tpu.memory_space<vmem>>, vector<8x1xf32>,
    %c0_26 = arith.constant 0 : index
    %c0_27 = arith.constant 0 : index
    %43 = vector.load %arg7[%c0_26, %c0_27] : memref<8x1xf32, #tpu.memory_space<vmem>>, vector<8x1xf32>
    tpu.vector_store %arg7[%c0_26, %c0_27], %12 {strides = array<i32>} : memref<8x1xf32, #tpu.memory_space<vmem>>, vector<8x1xf32>,
    %c0_i32_28 = arith.constant 0 : i32
    %44 = arith.cmpi eq, %arg1, %c0_i32_28 : i32
    %45 = arith.extui %44 : i1 to i32
    %c0_i32_29 = arith.constant 0 : i32
    %46 = arith.cmpi ne, %45, %c0_i32_29 : i32
    scf.if %46 {
      %c0_30 = arith.constant 0 : index
      %c0_31 = arith.constant 0 : index
      %47 = vector.load %arg5[%c0_30, %c0_31] : memref<8x1xf32, #tpu.memory_space<vmem>>, vector<8x1xf32>
      %c0_32 = arith.constant 0 : index
      %c0_33 = arith.constant 0 : index
      %48 = vector.load %arg6[%c0_32, %c0_33] : memref<8x1xf32, #tpu.memory_space<vmem>>, vector<8x1xf32>
      %49 = math.log %48 : vector<8x1xf32>
      %50 = arith.addf %47, %49 : vector<8x1xf32>
      %c0_34 = arith.constant 0 : index
      %c0_35 = arith.constant 0 : index
      %51 = vector.load %arg9[%c0_34, %c0_35] : memref<8x1xf32, #tpu.memory_space<vmem>>, vector<8x1xf32>
      %c0_36 = arith.constant 0 : index
      %c0_37 = arith.constant 0 : index
      %52 = vector.load %arg8[%c0_36, %c0_37] : memref<8x1xf32, #tpu.memory_space<vmem>>, vector<8x1xf32>
      %53 = arith.divf %51, %52 : vector<8x1xf32>
      %54 = arith.subf %50, %53 : vector<8x1xf32>
      %55 = vector.shape_cast %54 : vector<8x1xf32> to vector<1x8x1xf32>
      %cst_38 = arith.constant dense<0.000000e+00> : vector<1xf32>
      %56 = vector.multi_reduction <add>, %55, %cst_38 [1, 2] : vector<1x8x1xf32> to vector<1xf32>
      %57 = vector.shape_cast %56 : vector<1xf32> to vector<1x1x1xf32>
      %58 = vector.extract %57[0, 0, 0] : f32 from vector<1x1x1xf32>
      %59 = vector.broadcast %58 : f32 to vector<1x8x128xf32>
      %c0_39 = arith.constant 0 : index
      %c0_40 = arith.constant 0 : index
      %c0_41 = arith.constant 0 : index
      %60 = vector.load %arg4[%c0_39, %c0_40, %c0_41] : memref<1x8x128xf32, #tpu.memory_space<vmem>>, vector<1x8x128xf32>
      tpu.vector_store %arg4[%c0_39, %c0_40, %c0_41], %59 {strides = array<i32>} : memref<1x8x128xf32, #tpu.memory_space<vmem>>, vector<1x8x128xf32>,
    } else {
    }
    return
  }
  func.func @transform_0(%arg0: i32, %arg1: i32) -> (i32, i32) {
    %c0_i32 = arith.constant 0 : i32
    return %arg0, %arg1 : i32, i32
  }
  func.func @transform_1(%arg0: i32, %arg1: i32) -> (i32, i32) {
    %c0_i32 = arith.constant 0 : i32
    return %arg0, %arg1 : i32, i32
  }
  func.func @transform_2(%arg0: i32, %arg1: i32) -> (i32, i32, i32) {
    %c0_i32 = arith.constant 0 : i32
    %c0_i32_0 = arith.constant 0 : i32
    %c0_i32_1 = arith.constant 0 : i32
    return %arg0, %c0_i32, %c0_i32_0 : i32, i32, i32
  }
}

</mosaic_0001>

<bundles_post_ra>
// kernel: tpu_custom_call.1
= control target key start
LH: loop header
LB: loop body
LE: loop exit
PB: predicated region body
PF: predicated region fallthrough
CT: control target
= control target key end

     0   :  { %7 = vsyncpa [#allocation8], 0  ;;  %s288_s0 = inlined_call_operand.hbm [shape: f32[8,256], index: 0, kind: input, shape index: {}]   ;;  %s289_s1 = inlined_call_operand.hbm [shape: f32[8,256], index: 1, kind: input, shape index: {}]   ;;  %s290_s2 = inlined_call_operand.hbm [shape: f32[1,8,128], index: 2, kind: output, shape index: {}]  }
   0x1   :  { %8 = vsyncpa [#allocation11], 0 }
   0x2   :  { %9 = vsyncpa [#allocation9], 0  ;;  %s247_s9 = smov [#allocation7]   ;;  %s248_s11 = smov [#allocation10]  }
   0x3   :  { %s16_s10 = sshll.u32 %s247_s9, 4  ;;  %s26_s12 = sshll.u32 %s248_s11, 4  ;;  %s17_s10 = int_to_ptr.vmem [resolvable:$true] %s16_s10  ;;  %s27_s12 = int_to_ptr.vmem [resolvable:$true] %s26_s12 }
   0x4   :  { %s189_s13 = scalar_lea.vmem %s17_s10, 256  ;;  %p194_p1 = scmp.lt.s32.totalorder %s17_s10, %s17_s10 }
   0x5   :  { %p190_p0 = scmp.ne.s32.totalorder %s17_s10, %s189_s13  ;;  %p195_p2 = scmp.lt.s32.totalorder %s189_s13, %s189_s13 }
   0x7   :  { %p196_p3 = por %p195_p2, %p194_p1 }
   0x9   :  { %p197_p4 = pnand %p196_p3, %p190_p0 }
   0xb   :  { %200 = shalt.err (!%p197_p4)
}
   0xc   :  { %19 = dma.hbm_to_vmem [thread:$0]  %s288_s0, 256, %s17_s10, [#allocation8]  }
   0xd   :  { %s209_s16 = scalar_lea.vmem %s27_s12, 256  ;;  %p214_p6 = scmp.lt.s32.totalorder %s27_s12, %s27_s12 }
   0xe   :  { %p210_p5 = scmp.ne.s32.totalorder %s27_s12, %s209_s16  ;;  %p215_p7 = scmp.lt.s32.totalorder %s209_s16, %s209_s16 }
  0x10   :  { %p216_p8 = por %p215_p7, %p214_p6 }
  0x12   :  { %p217_p9 = pnand %p216_p8, %p210_p5 }
  0x14   :  { %220 = shalt.err (!%p217_p9)
}
  0x15   :  { %29 = dma.hbm_to_vmem [thread:$0]  %s289_s1, 256, %s27_s12, [#allocation11]  }
  0x16   :  { %241 = dma.done.wait [#allocation8], 256  }
  0x17   :  { %242 = vsyncadd [#allocation8], 4294967040 }
  0x18   :  { %243 = dma.done.wait [#allocation11], 256  }
  0x19   :  { %244 = vsyncadd [#allocation11], 4294967040  ;;  %vm40_vm0 = vcmask 7168   ;;  %v249_v0 = vmov -1e+30   ;;  %v46_v1 = vld [vmem:[#allocation7] sm:$0xff] }
  0x1a   :  { %41 = vst.msk [vmem:[#allocation2] sm:$0xff] %vm40_vm0, %v249_v0  ;;  %42 = vst.msk [vmem:[#allocation4] sm:$0xff] %vm40_vm0, %v249_v0  ;;  %v47_v2 = vld [vmem:[#allocation7 + $0x8] sm:$0xff]  ;;  %v48_v3 = vld [vmem:[#allocation10] sm:$0xff]  ;;  %v250_v7 = vmov 0   ;;  %v251_v8 = vmov 0.0  }
  0x1b   :  { %v52_v4 = vmax.f32 %v46_v1, %v47_v2  ;;  %v49_v5 = vld [vmem:[#allocation10 + $0x8] sm:$0xff]  ;;  %163 = vset.pattern.permute.xlu1 %v250_v7  ;;  %164 = vset.pattern.permute.xlu0 %v250_v7  ;;  %43 = vst.msk [vmem:[#allocation3] sm:$0xff] %vm40_vm0, %v251_v8  ;;  %44 = vst.msk [vmem:[#allocation5] sm:$0xff] %vm40_vm0, %v251_v8  ;;  %s252_s0 = smov [#allocation12]  }
  0x1c   :  { %v56_v6 = vmax.f32 %v48_v3, %v49_v5  ;;  %45 = vst.msk [vmem:[#allocation6] sm:$0xff] %vm40_vm0, %v251_v8  ;;  %s145_s1 = sshll.u32 %s252_s0, 4  ;;  %s146_s1 = int_to_ptr.vmem [resolvable:$true] %s145_s1 }
  0x1d   :  { %53 = vmax.xlane.f32.xlu0 %v52_v4  ;;  %s221_s20 = scalar_lea.vmem %s146_s1, 128  ;;  %p226_p11 = scmp.lt.s32.totalorder %s146_s1, %s146_s1 }
  0x1e   :  { %p222_p10 = scmp.ne.s32.totalorder %s146_s1, %s221_s20  ;;  %p227_p12 = scmp.lt.s32.totalorder %s221_s20, %s221_s20 }
  0x20   :  { %p228_p13 = por %p227_p12, %p226_p11 }
  0x21   :  { %57 = vmax.xlane.f32.xlu0 %v56_v6  ;;  %v50_v9 = vld [vmem:[#allocation2] sm:$0xff]  ;;  %v51_v12 = vld [vmem:[#allocation4] sm:$0xff] }
  0x22   :  { %v88_v39 = vld [vmem:[#allocation3] sm:$0xff]  ;;  %v96_v43 = vld [vmem:[#allocation5] sm:$0xff]  ;;  %p229_p0 = pnand %p228_p13, %p222_p10 }
  0x23   :  { %v103_v45 = vld [vmem:[#allocation6] sm:$0xff] }
  0xa6   :  { %v54_v10 = vpop.xlane.xlu0 %53 }
  0xa7   :  { %v55_v11 = vmax.f32 %v50_v9, %v54_v10 }
  0xa9   :  { %v60_v13 = vsub.f32 %v50_v9, %v55_v11  ;;  %112 = vst.msk [vmem:[#allocation2] sm:$0xff] %vm40_vm0, %v55_v11  ;;  %68 = vperm.xlu1 %163, %v55_v11  }
  0xaa   :  { %v58_v14 = vpop.xlane.xlu0 %57 }
  0xab   :  { %v59_v15 = vmax.f32 %v51_v12, %v58_v14  ;;  %v61_v36 = vmul.f32 1.442695, %v60_v13 }
  0xad   :  { %v63_v16 = vsub.f32 %v51_v12, %v59_v15  ;;  %113 = vst.msk [vmem:[#allocation4] sm:$0xff] %vm40_vm0, %v59_v15  ;;  %79 = vperm.xlu1 %163, %v59_v15  }
  0xaf   :  { %v64_v37 = vmul.f32 1.442695, %v63_v16 }
  0xb0   :  { %v117_v57 = vld [vmem:[#allocation2] sm:$0xff] }
 0x124   :  { %v69_v17 = vpop.permute.xlu1 %68 }
 0x125   :  { %v71_v18 = vsub.f32 %v46_v1, %v69_v17  ;;  %v72_v19 = vsub.f32 %v47_v2, %v69_v17 }
 0x127   :  { %v73_v20 = vmul.f32 1.442695, %v71_v18  ;;  %v75_v21 = vmul.f32 1.442695, %v72_v19 }
 0x128   :  { %v80_v22 = vpop.permute.xlu1 %79 }
 0x129   :  { %165 = vpow2.f32 %v73_v20  ;;  %v82_v23 = vsub.f32 %v48_v3, %v80_v22  ;;  %v83_v24 = vsub.f32 %v49_v5, %v80_v22 }
 0x12a   :  { %167 = vpow2.f32 %v75_v21 }
 0x12b   :  { %v84_v25 = vmul.f32 1.442695, %v82_v23  ;;  %v86_v26 = vmul.f32 1.442695, %v83_v24 }
 0x12d   :  { %169 = vpow2.f32 %v84_v25 }
 0x12e   :  { %171 = vpow2.f32 %v86_v26 }
 0x12f   :  { %173 = vpow2.f32 %v61_v36 }
 0x130   :  { %175 = vpow2.f32 %v64_v37 }
 0x136   :  { %v166_v27 = vpop.eup %165 }
 0x137   :  { %v168_v28 = vpop.eup %167 }
 0x138   :  { %v90_v29 = vadd.f32 %v168_v28, %v166_v27 }
 0x13a   :  { %v170_v30 = vpop.eup %169  ;;  %91 = vadd.xlane.f32.xlu0 %v90_v29 }
 0x13b   :  { %v172_v31 = vpop.eup %171  ;;  %v105_v32 = vmul.f32 %v170_v30, %v46_v1 }
 0x13c   :  { %v98_v33 = vadd.f32 %v172_v31, %v170_v30  ;;  %v106_v34 = vmul.f32 %v172_v31, %v47_v2  ;;  %v174_v38 = vpop.eup %173 }
 0x13d   :  { %v89_v40 = vmul.f32 %v174_v38, %v88_v39  ;;  %v176_v41 = vpop.eup %175 }
 0x13e   :  { %99 = vadd.xlane.f32.xlu1 %v98_v33  ;;  %v107_v35 = vadd.f32 %v106_v34, %v105_v32  ;;  %v97_v46 = vmul.f32 %v176_v41, %v96_v43  ;;  %v104_v49 = vmul.f32 %v176_v41, %v103_v45 }
 0x140   :  { %108 = vadd.xlane.f32.xlu0 %v107_v35 }
 0x1c3   :  { %v92_v42 = vpop.xlane.xlu0 %91 }
 0x1c4   :  { %v93_v44 = vadd.f32 %v92_v42, %v89_v40 }
 0x1c6   :  { %95 = vst.msk [vmem:[#allocation3] sm:$0xff] %vm40_vm0, %v93_v44 }
 0x1c7   :  { %v100_v47 = vpop.xlane.xlu1 %99 }
 0x1c8   :  { %v101_v48 = vadd.f32 %v100_v47, %v97_v46 }
 0x1c9   :  { %v109_v50 = vpop.xlane.xlu0 %108 }
 0x1ca   :  { %102 = vst.msk [vmem:[#allocation5] sm:$0xff] %vm40_vm0, %v101_v48  ;;  %v110_v51 = vadd.f32 %v109_v50, %v104_v49 }
 0x1cc   :  { %111 = vst.msk [vmem:[#allocation6] sm:$0xff] %vm40_vm0, %v110_v51 }
 0x1cd   :  { %v118_v52 = vld [vmem:[#allocation3] sm:$0xff] }
 0x1ce   :  { %177 = vlog2.f32 %v118_v52 }
 0x1d1   :  { %v123_v53 = vld [vmem:[#allocation5] sm:$0xff] }
 0x1d2   :  { %179 = vrcp.f32 %v123_v53 }
 0x1d3   :  { %v122_v58 = vld [vmem:[#allocation6] sm:$0xff] }
 0x1db   :  { %v178_v54 = vpop.eup %177 }
 0x1dc   :  { %v120_v55 = vmul.f32 0.6931472, %v178_v54 }
 0x1de   :  { %v121_v59 = vadd.f32 %v120_v55, %v117_v57 }
 0x1df   :  { %v180_v56 = vpop.eup %179 }
 0x1e0   :  { %v125_v60 = vmul.f32 %v180_v56, %v122_v58 }
 0x1e2   :  { %v126_v61 = vsub.f32 %v121_v59, %v125_v60 }
 0x1e4   :  { %v127_v62 = vsel %vm40_vm0, %v126_v61, 0.0 }
 0x1e5   :  { %128 = vadd.xlane.f32.xlu0 %v127_v62 }
 0x26e   :  { %v129_v63 = vpop.xlane.xlu0 %128 }
 0x26f   :  { %v130_v0 = vrot.slane %v129_v63, 4 }
 0x271   :  { %v131_v1 = vadd.f32 %v130_v0, %v129_v63 }
 0x273   :  { %v132_v2 = vrot.slane %v131_v1, 2 }
 0x275   :  { %v133_v3 = vadd.f32 %v132_v2, %v131_v1 }
 0x277   :  { %v134_v4 = vrot.slane %v133_v3, 1 }
 0x279   :  { %v135_v5 = vadd.f32 %v134_v4, %v133_v3 }
 0x27b   :  { %155 = vpush %v135_v5 }
 0x2ac   :  { %s156_s19 = spop %155 }
 0x2ad   :  { %v137_v6 = vstv %s156_s19 }
 0x2ae   :  { %138 = vst [vmem:[#allocation12] sm:$0xff] %v137_v6 }
 0x2af   :  { %232 = shalt.err (!%p229_p0)
}
 0x2b0   :  { %148 = dma.vmem_to_hbm [thread:$0]  %s146_s1, 128, %s290_s2, [#allocation9]  }
 0x2b1   :  { %245 = dma.done.wait [#allocation9], 128  }
 0x2b2   :  { %246 = vsyncadd [#allocation9], 4294967168 }
 0x2b3   :  { %152 = vsyncpa [#allocation8], 1 }
 0x2b4   :  { %153 = vsyncpa [#allocation11], 1 }
 0x2b5   :  { %154 = vsyncpa [#allocation9], 1 }

</bundles_post_ra>
